<compile_context>
chip_gen: v7x
topology: tpu7x:2x2x1
jax: 0.10.0
libtpu: 0.0.40
codegen_flags: <defaults>
</compile_context>

<pallas_src>
import math
import functools

import jax
import jax.numpy as jnp
from jax.experimental import pallas as pl
from jax.experimental.pallas import tpu as pltpu


def _round_up(v, m):
    return (v + m - 1) // m * m


def _vmem_budget_bytes():
    """Scoped-VMEM budget: ~85% of physical, capped at 100 MiB.

    v5e/v6e have 128 MiB physical VMEM, v7x only 64 MiB; the default scoped
    limit (16/32 MiB) is far below physical, so we raise it explicitly.
    """
    try:
        cap = int(pltpu.get_tpu_info().vmem_capacity_bytes)
    except Exception:
        cap = 64 << 20  # conservative fallback: v7x physical VMEM per core
    return min(int(cap * 0.85), 100 << 20)


# ---------------------------------------------------------------------------
# Fast path: everything resident, both layers in one kernel body, grid=(1,).
# ---------------------------------------------------------------------------
def _gcn_resident_kernel(adj_ref, xw1_ref, b1_ref, w2_ref, b2_ref, out_ref):
    adj = adj_ref[...]                                        # bf16 [Np, Np]
    # layer 1: h = relu(adj @ (x W1) + b1)   (f32 accumulate, f32 bias/relu)
    h = jnp.dot(adj, xw1_ref[...], preferred_element_type=jnp.float32)
    h = jnp.maximum(h + b1_ref[...], 0.0)
    # layer 2: out = adj @ (h @ W2) + b2
    hw2 = jnp.dot(h.astype(jnp.bfloat16), w2_ref[...],
                  preferred_element_type=jnp.float32)
    out = jnp.dot(adj, hw2.astype(jnp.bfloat16),
                  preferred_element_type=jnp.float32) + b2_ref[...]
    out_ref[...] = out


# ---------------------------------------------------------------------------
# Streamed path: grid = (layer, row_tile); adj row strips streamed from HBM,
# xW1 / W2 / biases resident, intermediate h kept in a VMEM scratch.
# ---------------------------------------------------------------------------
def _gcn_streamed_kernel(adj_ref, xw1_ref, b1_ref, w2_ref, b2_ref,
                         out_ref, h_ref, *, tm):
    layer = pl.program_id(0)
    i = pl.program_id(1)
    adj_strip = adj_ref[...]                                  # bf16 [tm, Np]

    @pl.when(layer == 0)
    def _layer1():
        # h_strip = relu(adj_strip @ xW1 + b1); kept resident in the VMEM scratch.
        h = jnp.dot(adj_strip, xw1_ref[...], preferred_element_type=jnp.float32)
        h = jnp.maximum(h + b1_ref[...], 0.0)
        row0 = pl.multiple_of(i * tm, tm)
        h_ref[pl.ds(row0, tm), :] = h.astype(h_ref.dtype)
        # NOTE: no out_ref write here. The out_specs index_map parks every
        # layer-0 step on output block 0, so no (uninitialized) block is ever
        # written back to HBM before layer 1 produces real rows.

    @pl.when(layer == 1)
    def _layer2():
        # out_strip = (adj_strip @ h) @ W2 + b2
        agg = jnp.dot(adj_strip, h_ref[...], preferred_element_type=jnp.float32)
        out = jnp.dot(agg.astype(w2_ref.dtype), w2_ref[...],
                      preferred_element_type=jnp.float32) + b2_ref[...]
        out_ref[...] = out


def _fits_resident(np_, fp, budget):
    bf16b, f32b = 2, 4
    need = 2 * np_ * np_ * bf16b            # adj (conservatively assume 2 buffers)
    need += np_ * fp * bf16b                # xW1
    need += fp * fp * bf16b + 2 * fp * f32b  # W2 + biases
    need += 4 * np_ * fp * f32b             # output + f32 intermediates headroom
    need += 2 << 20
    return np_ <= 2048 and need <= budget


def _pick_tm(np0, fp, budget, max_tm):
    bf16b, f32b = 2, 4
    resident = 2 * np0 * fp * bf16b          # xW1 + h scratch
    resident += fp * fp * bf16b + 2 * fp * f32b
    resident += 2 << 20                      # slack (intermediates, alignment)
    for tm in (512, 256, 128, 64, 32, 16):   # multiples of 16: bf16-friendly offsets
        if max_tm is not None and tm > max_tm:
            continue
        need = resident + 2 * tm * np0 * bf16b + 2 * tm * fp * f32b
        if need <= budget:
            return tm
    # TODO(synk): for graphs where even xW1 + h residency blows VMEM, add a
    # k-tiled reduction over adj columns / spill h to HBM.
    return 16


@functools.partial(jax.jit, static_argnames=("force_streamed", "max_tm"))
def gcn_forward(x, adj, params, force_streamed=False, max_tm=None):
    """GCN.forward (inference): adj @ (relu(adj @ (x W1) + b1) @ W2) + b2."""
    n, _ = x.shape
    nhid = params["w1"].shape[1]
    fp = _round_up(nhid, 128)                # lane-dense hidden/output feature dim
    f32, bf16 = jnp.float32, jnp.bfloat16

    budget = _vmem_budget_bytes()
    use_resident = (not force_streamed) and _fits_resident(_round_up(n, 8), fp, budget)

    if use_resident:
        np_ = _round_up(n, 8)
        tm = np_
    else:
        np0 = _round_up(n, 8)
        tm = _pick_tm(np0, fp, budget, max_tm)
        np_ = _round_up(np0, tm)

    # Wrapper-side precompute + padding (pad/convert fuse into one pass under jit).
    xw1 = x.astype(f32) @ params["w1"].astype(f32)                       # [n, nhid]
    xw1p = jnp.zeros((np_, fp), bf16).at[:n, :nhid].set(xw1.astype(bf16))
    if np_ == n:
        adjp = adj.astype(bf16)
    else:
        # Padded adj COLUMNS must be zero: layer 2 multiplies them against the
        # (non-zero, = relu(b1)) padded rows of h.
        adjp = jnp.zeros((np_, np_), bf16).at[:n, :n].set(adj.astype(bf16))
    w2p = jnp.zeros((fp, fp), bf16).at[:nhid, :nhid].set(params["w2"].astype(bf16))
    b1p = jnp.zeros((1, fp), f32).at[:, :nhid].set(
        params["b1"].reshape(1, -1).astype(f32))
    b2p = jnp.zeros((1, fp), f32).at[:, :nhid].set(
        params["b2"].reshape(1, -1).astype(f32))

    if use_resident:
        out_padded = pl.pallas_call(
            _gcn_resident_kernel,
            out_shape=jax.ShapeDtypeStruct((np_, fp), f32),
            grid=(1,),
            in_specs=[
                pl.BlockSpec((np_, np_), lambda i: (0, 0)),   # adj (resident, read once)
                pl.BlockSpec((np_, fp), lambda i: (0, 0)),    # x @ W1
                pl.BlockSpec((1, fp), lambda i: (0, 0)),      # b1
                pl.BlockSpec((fp, fp), lambda i: (0, 0)),     # W2
                pl.BlockSpec((1, fp), lambda i: (0, 0)),      # b2
            ],
            out_specs=pl.BlockSpec((np_, fp), lambda i: (0, 0)),
            compiler_params=pltpu.CompilerParams(
                dimension_semantics=("arbitrary",),
                vmem_limit_bytes=budget,
            ),
        )(adjp, xw1p, b1p, w2p, b2p)
    else:
        r = np_ // tm
        kernel = functools.partial(_gcn_streamed_kernel, tm=tm)
        out_padded = pl.pallas_call(
            kernel,
            out_shape=jax.ShapeDtypeStruct((np_, fp), f32),
            grid=(2, r),                                      # (layer, row_tile)
            in_specs=[
                pl.BlockSpec((tm, np_), lambda l, i: (i, 0)),  # adj row strip (streamed)
                pl.BlockSpec((np_, fp), lambda l, i: (0, 0)),  # x @ W1 (resident)
                pl.BlockSpec((1, fp), lambda l, i: (0, 0)),    # b1
                pl.BlockSpec((fp, fp), lambda l, i: (0, 0)),   # W2
                pl.BlockSpec((1, fp), lambda l, i: (0, 0)),    # b2
            ],
            # Layer 0 (l==0) maps every step to output block 0 and never writes
            # it; blocks only change (and get written back) during layer 1, so
            # each output tile is DMA'd to HBM exactly once with real data.
            out_specs=pl.BlockSpec((tm, fp), lambda l, i: (i * l, 0)),
            scratch_shapes=[pltpu.VMEM((np_, fp), bf16)],      # h stays on-chip
            compiler_params=pltpu.CompilerParams(
                # Both axes must stay sequential on one core: layer 2 reads h
                # rows produced by every row tile of layer 1 via the per-core
                # VMEM scratch.  TODO(synk): 2-call variant (h through HBM) to
                # use both TensorCores on v7x.
                dimension_semantics=("arbitrary", "arbitrary"),
                vmem_limit_bytes=budget,
            ),
        )(adjp, xw1p, b1p, w2p, b2p)

    return out_padded[:n, :nhid]


def init_gcn_params(key, nfeat, nhid):
    """Deterministic init mirroring GraphConvolution.reset_parameters."""
    k1, k2, k3, k4 = jax.random.split(key, 4)
    stdv1 = 1.0 / math.sqrt(nhid)   # gc1: out_features = nhid
    stdv2 = 1.0 / math.sqrt(nhid)   # gc2: out_features = nhid
    return {
        "w1": jax.random.uniform(k1, (nfeat, nhid), jnp.float32, -stdv1, stdv1),
        "b1": jax.random.uniform(k2, (1, nhid), jnp.float32, -stdv1, stdv1),
        "w2": jax.random.uniform(k3, (nhid, nhid), jnp.float32, -stdv2, stdv2),
        "b2": jax.random.uniform(k4, (1, nhid), jnp.float32, -stdv2, stdv2),
    }


def _make_graph(key, n_nodes, nfeat):
    kx, kadj = jax.random.split(key)
    x = jax.random.normal(kx, (n_nodes, nfeat), dtype=jnp.float32)
    a = (jax.random.uniform(kadj, (n_nodes, n_nodes)) > 0.5).astype(jnp.float32)
    a = jnp.maximum(a, a.T) + jnp.eye(n_nodes, dtype=jnp.float32)
    adj = a / jnp.sum(a, axis=1, keepdims=True)   # symmetric, row-normalized
    return x, adj


def _reference(x, adj, params):
    h = jnp.maximum(adj @ (x @ params["w1"]) + params["b1"], 0.0)
    return adj @ (h @ params["w2"]) + params["b2"]


if __name__ == "__main__":
    # config: word_embed_dim=16, graph_hidden_size=32, bias=True, gcn_dropout=0.5
    NFEAT = 16
    NHID = 32

    key = jax.random.PRNGKey(0)
    kg1, kg2, kparams = jax.random.split(key, 3)
    params = init_gcn_params(kparams, NFEAT, NHID)

    # ---- Shipped config (N=8): exercises the fully-resident fast path. -------
    x, adj = _make_graph(kg1, 8, NFEAT)
    ref = _reference(x, adj, params)
    out = jax.block_until_ready(gcn_forward(x, adj, params))
    assert out.shape == (8, NHID)
    # bf16 MXU operands (f32 accumulation) -> loosened tolerance vs f32 reference.
    assert jnp.allclose(out, ref, atol=3e-2, rtol=3e-2), \
        f"fast path max|diff|={float(jnp.max(jnp.abs(out - ref)))}"

    # ---- Larger graph with forced streaming: exercises the multi-row-strip
    # fused two-layer path (padding, VMEM h scratch, collapsed layer-0 out map).
    x2, adj2 = _make_graph(kg2, 200, NFEAT)
    ref2 = _reference(x2, adj2, params)
    out2 = jax.block_until_ready(
        gcn_forward(x2, adj2, params, force_streamed=True, max_tm=64))
    assert out2.shape == (200, NHID)
    assert jnp.allclose(out2, ref2, atol=3e-2, rtol=3e-2), \
        f"streamed path max|diff|={float(jnp.max(jnp.abs(out2 - ref2)))}"

    print("KERNEL_OK")
</pallas_src>

<mosaic_0001>
module attributes {stable_mosaic.version = 11 : i64} {
  func.func @_gcn_resident_kernel(%arg0: i32, %arg1: memref<8x8xbf16, #tpu.memory_space<vmem>>, %arg2: memref<8x128xbf16, #tpu.memory_space<vmem>>, %arg3: memref<1x128xf32, #tpu.memory_space<vmem>>, %arg4: memref<128x128xbf16, #tpu.memory_space<vmem>>, %arg5: memref<1x128xf32, #tpu.memory_space<vmem>>, %arg6: memref<8x128xf32, #tpu.memory_space<vmem>>) attributes {dimension_semantics = [#tpu.dimension_semantics<arbitrary>], iteration_bounds = array<i64: 1>, scalar_prefetch = 0 : i64, scratch_operands = 0 : i64, tpu.core_type = #tpu.core_type<tc>, window_params = [{pipeline_mode = #tpu.pipeline_mode<synchronous>, transform_indices = @transform_0, window_bounds = array<i64: 8, 8>}, {pipeline_mode = #tpu.pipeline_mode<synchronous>, transform_indices = @transform_1, window_bounds = array<i64: 8, 128>}, {pipeline_mode = #tpu.pipeline_mode<synchronous>, transform_indices = @transform_2, window_bounds = array<i64: 1, 128>}, {pipeline_mode = #tpu.pipeline_mode<synchronous>, transform_indices = @transform_3, window_bounds = array<i64: 128, 128>}, {pipeline_mode = #tpu.pipeline_mode<synchronous>, transform_indices = @transform_4, window_bounds = array<i64: 1, 128>}, {pipeline_mode = #tpu.pipeline_mode<synchronous>, transform_indices = @transform_5, window_bounds = array<i64: 8, 128>}]} {
    %c0 = arith.constant 0 : index
    %c0_0 = arith.constant 0 : index
    %0 = vector.load %arg1[%c0, %c0_0] : memref<8x8xbf16, #tpu.memory_space<vmem>>, vector<8x8xbf16>
    %c0_1 = arith.constant 0 : index
    %c0_2 = arith.constant 0 : index
    %1 = vector.load %arg2[%c0_1, %c0_2] : memref<8x128xbf16, #tpu.memory_space<vmem>>, vector<8x128xbf16>
    %cst = arith.constant dense<0.000000e+00> : vector<8x128xf32>
    %2 = tpu.matmul %0, %1, %cst {dimension_numbers = #tpu.dot_dimension_numbers<[1], [0], [0], [1], [0, 0, 1, 1], [], []>} : vector<8x8xbf16>, vector<8x128xbf16>, vector<8x128xf32> -> vector<8x128xf32>
    %c0_3 = arith.constant 0 : index
    %c0_4 = arith.constant 0 : index
    %3 = vector.load %arg3[%c0_3, %c0_4] : memref<1x128xf32, #tpu.memory_space<vmem>>, vector<1x128xf32>
    %4 = vector.broadcast %3 : vector<1x128xf32> to vector<8x128xf32>
    %5 = arith.addf %2, %4 : vector<8x128xf32>
    %cst_5 = arith.constant 0.000000e+00 : f32
    %6 = vector.broadcast %cst_5 : f32 to vector<8x128xf32>
    %7 = arith.maximumf %5, %6 : vector<8x128xf32>
    %8 = arith.truncf %7 : vector<8x128xf32> to vector<8x128xbf16>
    %c0_6 = arith.constant 0 : index
    %c0_7 = arith.constant 0 : index
    %9 = vector.load %arg4[%c0_6, %c0_7] : memref<128x128xbf16, #tpu.memory_space<vmem>>, vector<128x128xbf16>
    %cst_8 = arith.constant dense<0.000000e+00> : vector<8x128xf32>
    %10 = tpu.matmul %8, %9, %cst_8 {dimension_numbers = #tpu.dot_dimension_numbers<[1], [0], [0], [1], [0, 0, 1, 1], [], []>} : vector<8x128xbf16>, vector<128x128xbf16>, vector<8x128xf32> -> vector<8x128xf32>
    %11 = arith.truncf %10 : vector<8x128xf32> to vector<8x128xbf16>
    %cst_9 = arith.constant dense<0.000000e+00> : vector<8x128xf32>
    %12 = tpu.matmul %0, %11, %cst_9 {dimension_numbers = #tpu.dot_dimension_numbers<[1], [0], [0], [1], [0, 0, 1, 1], [], []>} : vector<8x8xbf16>, vector<8x128xbf16>, vector<8x128xf32> -> vector<8x128xf32>
    %c0_10 = arith.constant 0 : index
    %c0_11 = arith.constant 0 : index
    %13 = vector.load %arg5[%c0_10, %c0_11] : memref<1x128xf32, #tpu.memory_space<vmem>>, vector<1x128xf32>
    %14 = vector.broadcast %13 : vector<1x128xf32> to vector<8x128xf32>
    %15 = arith.addf %12, %14 : vector<8x128xf32>
    %c0_12 = arith.constant 0 : index
    %c0_13 = arith.constant 0 : index
    %16 = vector.load %arg6[%c0_12, %c0_13] : memref<8x128xf32, #tpu.memory_space<vmem>>, vector<8x128xf32>
    tpu.vector_store %arg6[%c0_12, %c0_13], %15 {strides = array<i32>} : memref<8x128xf32, #tpu.memory_space<vmem>>, vector<8x128xf32>,
    return
  }
  func.func @transform_0(%arg0: i32) -> (i32, i32) {
    %c0_i32 = arith.constant 0 : i32
    %c0_i32_0 = arith.constant 0 : i32
    %c0_i32_1 = arith.constant 0 : i32
    return %c0_i32, %c0_i32_0 : i32, i32
  }
  func.func @transform_1(%arg0: i32) -> (i32, i32) {
    %c0_i32 = arith.constant 0 : i32
    %c0_i32_0 = arith.constant 0 : i32
    %c0_i32_1 = arith.constant 0 : i32
    return %c0_i32, %c0_i32_0 : i32, i32
  }
  func.func @transform_2(%arg0: i32) -> (i32, i32) {
    %c0_i32 = arith.constant 0 : i32
    %c0_i32_0 = arith.constant 0 : i32
    %c0_i32_1 = arith.constant 0 : i32
    return %c0_i32, %c0_i32_0 : i32, i32
  }
  func.func @transform_3(%arg0: i32) -> (i32, i32) {
    %c0_i32 = arith.constant 0 : i32
    %c0_i32_0 = arith.constant 0 : i32
    %c0_i32_1 = arith.constant 0 : i32
    return %c0_i32, %c0_i32_0 : i32, i32
  }
  func.func @transform_4(%arg0: i32) -> (i32, i32) {
    %c0_i32 = arith.constant 0 : i32
    %c0_i32_0 = arith.constant 0 : i32
    %c0_i32_1 = arith.constant 0 : i32
    return %c0_i32, %c0_i32_0 : i32, i32
  }
  func.func @transform_5(%arg0: i32) -> (i32, i32) {
    %c0_i32 = arith.constant 0 : i32
    %c0_i32_0 = arith.constant 0 : i32
    %c0_i32_1 = arith.constant 0 : i32
    return %c0_i32, %c0_i32_0 : i32, i32
  }
}

</mosaic_0001>

<bundles_post_ra>
// kernel: gcn_forward.1
= control target key start
LH: loop header
LB: loop body
LE: loop exit
PB: predicated region body
PF: predicated region fallthrough
CT: control target
= control target key end

     0   :  { %vm35_vm0 = vcmask 1043456   ;;  %vm31_vm1 = vcmask 64512   ;;  %v343_v1 = vmov 0.0   ;;  %vm344_vm2 = vmmov 0   ;;  %s428_s0 = inlined_call_operand.vmem [shape: bf16[8,8], index: 0, kind: input, shape index: {}]   ;;  %s429_s1 = inlined_call_operand.vmem [shape: bf16[8,128], index: 1, kind: input, shape index: {}]   ;;  %s430_s2 = inlined_call_operand.vmem [shape: f32[1,128], index: 2, kind: input, shape index: {}]   ;;  %s431_s3 = inlined_call_operand.vmem [shape: bf16[128,128], index: 3, kind: input, shape index: {}]   ;;  %s432_s4 = inlined_call_operand.vmem [shape: f32[1,128], index: 4, kind: input, shape index: {}]   ;;  %s433_s5 = inlined_call_operand.hbm [shape: f32[8,128], index: 5, kind: output, shape index: {}]  }
   0x1   :  { %v23_v0 = vld [vmem:[%s429_s1] sm:$0xf]  ;;  %276 = vmatprep.subr.bf16.mxu0 %v343_v1  ;;  %278 = vmatprep.mubr.msk.bf16.mxu0 %vm344_vm2, %v343_v1  ;;  %v312_v5 = vld [vmem:[%s431_s3 + $0x8] sm:$0xff]   ;;  %v313_v6 = vld [vmem:[%s431_s3 + $0x10] sm:$0xff]  }
   0x2   :  { %v37_v2 = vsel %vm35_vm0, %v23_v0, 0  ;;  %v22_v3 = vld [vmem:[%s428_s0] sm:$0xf]  ;;  %282 = vmatprep.subr.bf16.mxu1 %v343_v1  ;;  %298 = vmatprep.mubr.msk.bf16.mxu1 %vm344_vm2, %v343_v1 }
   0x3   :  { %v311_v4 = vld [vmem:[%s431_s3] sm:$0xff]   ;;  %277 = vmatpush3.bf16.msra.mxu0 %v37_v2 }
   0x4   :  { %283 = vmatpush3.bf16.msra.mxu1 %v311_v4  ;;  %302 = vmatprep.subr.bf16.mxu0 %v343_v1 }
   0x5   :  { %284 = vmatprep.subr.bf16.mxu1 %v343_v1 }
   0x6   :  { %279 = vmatmul.mubr.msk.bf16.vlgmr.msra.gmra.mrb[0].mxu0 %vm31_vm1, %v22_v3 }
   0x7   :  { %304 = vmatprep.mubr.msk.bf16.mxu0 %vm344_vm2, %v343_v1 }
   0x8   :  { %285 = vmatpush3.bf16.msra.mxu1 %v312_v5 }
   0x9   :  { %286 = vmatprep.subr.bf16.mxu1 %v343_v1 }
   0xa   :  { %10 = vsyncpa [#allocation3], 0  ;;  %v314_v7 = vld [vmem:[%s431_s3 + $0x18] sm:$0xff]   ;;  %v315_v8 = vld [vmem:[%s431_s3 + $0x20] sm:$0xff]   ;;  %s345_s13 = smov [#allocation2]  }
   0xb   :  { %v316_v9 = vld [vmem:[%s431_s3 + $0x28] sm:$0xff]   ;;  %v317_v10 = vld [vmem:[%s431_s3 + $0x30] sm:$0xff]   ;;  %v318_v11 = vld [vmem:[%s431_s3 + $0x38] sm:$0xff]   ;;  %s243_s14 = sshll.u32 %s345_s13, 4  ;;  %s244_s14 = int_to_ptr.vmem [resolvable:$true] %s243_s14 }
   0xc   :  { %287 = vmatpush3.bf16.msra.mxu1 %v313_v6  ;;  %v251_v12 = vld [vmem:[%s430_s2] ss:$0 sm:$0xff]  ;;  %s319_s15 = scalar_lea.vmem %s244_s14, 128  ;;  %p324_p1 = scmp.lt.s32.totalorder %s244_s14, %s244_s14 }
   0xd   :  { %288 = vmatprep.subr.bf16.mxu1 %v343_v1  ;;  %v261_v26 = vld [vmem:[%s432_s4] ss:$0 sm:$0xff]  ;;  %p320_p0 = scmp.ne.s32.totalorder %s244_s14, %s319_s15  ;;  %p325_p2 = scmp.lt.s32.totalorder %s319_s15, %s319_s15 }
   0xf   :  { %p326_p3 = por %p325_p2, %p324_p1 }
  0x10   :  { %289 = vmatpush3.bf16.msra.mxu1 %v314_v7 }
  0x11   :  { %290 = vmatprep.subr.bf16.mxu1 %v343_v1  ;;  %p327_p4 = pnand %p326_p3, %p320_p0 }
  0x14   :  { %291 = vmatpush3.bf16.msra.mxu1 %v315_v8 }
  0x15   :  { %292 = vmatprep.subr.bf16.mxu1 %v343_v1 }
  0x18   :  { %293 = vmatpush3.bf16.msra.mxu1 %v316_v9 }
  0x19   :  { %294 = vmatprep.subr.bf16.mxu1 %v343_v1 }
  0x1c   :  { %295 = vmatpush3.bf16.msra.mxu1 %v317_v10 }
  0x1d   :  { %296 = vmatprep.subr.bf16.mxu1 %v343_v1 }
  0x20   :  { %297 = vmatpush3.bf16.msra.mxu1 %v318_v11 }
  0xd9   :  { %v73_v13 = vpop.f32.mrb[0].mxu0 }
  0xda   :  { %v74_v14 = vadd.f32 %v251_v12, %v73_v13  ;;  %v280_v15 = vpop.f32.mrb[1].mxu0 }
  0xdb   :  { %v76_v16 = vpop.f32.mrb[2].mxu0 }
  0xdc   :  { %v79_v17 = vmax.f32 %v74_v14, 0.0  ;;  %v281_v18 = vpop.f32.mrb[3].mxu0 }
  0xde   :  { %v80_v19 = vpack.c.bf16 %v79_v17, %v79_v17 }
  0xe0   :  { %299 = vmatmul.mubr.bf16.vlgmr.msra.gmra.mrb[0].mxu1 %v80_v19 }
 0x1b3   :  { %v179_v20 = vpop.f32.mrb[0].mxu1 }
 0x1b4   :  { %v185_v21 = vpack.c.bf16 %v179_v20, %v179_v20  ;;  %v300_v22 = vpop.f32.mrb[1].mxu1 }
 0x1b5   :  { %v182_v23 = vpop.f32.mrb[2].mxu1 }
 0x1b6   :  { %v194_v24 = vsel %vm35_vm0, %v185_v21, 0  ;;  %v301_v25 = vpop.f32.mrb[3].mxu1 }
 0x1b7   :  { %303 = vmatpush3.bf16.msra.mxu0 %v194_v24 }
 0x1ba   :  { %305 = vmatmul.mubr.msk.bf16.vlgmr.msra.gmra.mrb[4].mxu0 %vm31_vm1, %v22_v3 }
 0x28d   :  { %v230_v27 = vpop.f32.mrb[4].mxu0 }
 0x28e   :  { %v231_v28 = vadd.f32 %v261_v26, %v230_v27  ;;  %v306_v29 = vpop.f32.mrb[5].mxu0 }
 0x28f   :  { %v233_v30 = vpop.f32.mrb[6].mxu0 }
 0x290   :  { %236 = vst [vmem:[#allocation2] sm:$0xff] %v231_v28  ;;  %v307_v31 = vpop.f32.mrb[7].mxu0 }
 0x291   :  { %330 = shalt.err (!%p327_p4)
}
 0x292   :  { %s331_s4 = scalar_lea.hbm %s433_s5, 128 }
 0x293   :  { %p332_p5 = scmp.ne.s32.totalorder %s433_s5, %s331_s4  ;;  %p335_p6 = scmp.lt.u32.totalorder %s331_s4, %s433_s5 }
 0x295   :  { %p337_p7 = pnand %p335_p6, %p332_p5 }
 0x297   :  { %340 = shalt.err (!%p337_p7)
}
 0x298   :  { %246 = dma.vmem_to_hbm [thread:$0]  %s244_s14, 128, %s433_s5, [#allocation3]  }
 0x299   :  { %341 = dma.done.wait [#allocation3], 128  }
 0x29a   :  { %342 = vsyncadd [#allocation3], 4294967168 }
 0x29b   :  { %250 = vsyncpa [#allocation3], 1 }

</bundles_post_ra>
